<compile_context>
chip_gen: v6e
topology: v6e:2x2x1
jax: 0.10.0
libtpu: 0.0.40
codegen_flags: <defaults>
</compile_context>

<pallas_src>
import numpy as np
import jax
import jax.numpy as jnp
from jax.experimental import pallas as pl
from jax.experimental.pallas import tpu as pltpu


def _dma_identity_kernel(x_hbm_ref, o_hbm_ref, sem):
    # Whole-array HBM -> HBM copy on the DMA engines.
    # No VMEM round-trip, no grid steps, no TensorCore vld/vst work.
    cp = pltpu.make_async_copy(x_hbm_ref, o_hbm_ref, sem)
    cp.start()
    cp.wait()


def _pallas_identity_copy(x: jax.Array) -> jax.Array:
    nbytes = x.size * jnp.dtype(x.dtype).itemsize
    return pl.pallas_call(
        _dma_identity_kernel,
        out_shape=jax.ShapeDtypeStruct(x.shape, x.dtype),
        in_specs=[pl.BlockSpec(memory_space=pl.ANY)],
        out_specs=pl.BlockSpec(memory_space=pl.ANY),
        scratch_shapes=[pltpu.SemaphoreType.DMA],
        cost_estimate=pl.CostEstimate(
            flops=0, transcendentals=0, bytes_accessed=2 * nbytes),
    )(x)


def pallas_identity_forward(x: jax.Array, *, force_kernel: bool = False) -> jax.Array:
    """Identity 'forward'.

    Default path returns `x` untouched (zero data movement — the fastest
    correct implementation of an identity on any TPU generation).
    `force_kernel=True` routes through a single HBM->HBM DMA Pallas kernel so
    the Pallas path can be exercised/tested.
    """
    if x.size == 0 or not force_kernel:
        return x
    return _pallas_identity_copy(x)


class ModelInterfaceJAX:
    """
    JAX/Pallas port of kmembert ModelInterface.

    Mirrors the PyTorch constructor state.  step() stays abstract (as in the
    reference); forward() is an identity pass-through (the reference forward()
    raises NotImplementedError), with an optional Pallas DMA-copy path.
    """

    def __init__(self, device=None, config=None):
        self.device = device
        self.config = config
        self.best_loss = np.inf
        self.early_stopping = 0

    def initialize_scheduler(self, epochs=0, train_loader=()):
        # TODO(synk): optimizer / get_linear_schedule_with_warmup is training
        # glue with no Pallas equivalent; only the step count is tracked.
        self.total_steps = len(train_loader) * epochs

    def step(self, *args, **kwargs):
        raise NotImplementedError  # abstract in the reference module

    def forward(self, x, *, force_kernel: bool = False):
        # Reference forward() raises NotImplementedError; identity
        # pass-through is the only faithful semantics.
        return pallas_identity_forward(x, force_kernel=force_kernel)

    __call__ = forward


if __name__ == "__main__":
    key = jax.random.PRNGKey(0)
    model = ModelInterfaceJAX(device=jax.devices()[0], config=None)

    # 1) Small NCHW input consistent with the module's demo usage.
    #    Default path: no kernel (identity bypass).
    x_small = jax.random.normal(key, (2, 4, 16, 16), dtype=jnp.float32)
    y_fast = jax.block_until_ready(model(x_small))
    np.testing.assert_array_equal(np.asarray(y_fast), np.asarray(x_small))

    # 2) Forced Pallas path: single HBM->HBM DMA copy, arbitrary shape,
    #    no padding/reshape plumbing.
    y_kern = jax.block_until_ready(model(x_small, force_kernel=True))
    assert y_kern.shape == x_small.shape and y_kern.dtype == x_small.dtype
    np.testing.assert_array_equal(np.asarray(y_kern), np.asarray(x_small))

    # 3) A lane-dense shape through the same DMA path (still small/fast).
    x_big = jax.random.normal(key, (2, 4, 32, 128), dtype=jnp.float32)
    y_big = jax.block_until_ready(model(x_big, force_kernel=True))
    assert y_big.shape == x_big.shape and y_big.dtype == x_big.dtype
    np.testing.assert_array_equal(np.asarray(y_big), np.asarray(x_big))

    print("KERNEL_OK")
</pallas_src>

<mosaic_0001>
module attributes {stable_mosaic.version = 11 : i64} {
  func.func @_dma_identity_kernel(%arg0: memref<2x4x16x16xf32, #tpu.memory_space<any>>, %arg1: memref<2x4x16x16xf32, #tpu.memory_space<any>>, %arg2: memref<!tpu.dma_semaphore, #tpu.memory_space<semaphore_mem>>) attributes {dimension_semantics = [], scalar_prefetch = 0 : i64, scratch_operands = 1 : i64, tpu.core_type = #tpu.core_type<tc>} {
    tpu.enqueue_dma source(%arg0 : memref<2x4x16x16xf32, #tpu.memory_space<any>>) target(%arg1 : memref<2x4x16x16xf32, #tpu.memory_space<any>>) target_semaphore(%arg2 : memref<!tpu.dma_semaphore, #tpu.memory_space<semaphore_mem>>)
    tpu.wait_dma2 semaphore(%arg2 : memref<!tpu.dma_semaphore, #tpu.memory_space<semaphore_mem>>) src(%arg0 : memref<2x4x16x16xf32, #tpu.memory_space<any>>) dst(%arg1 : memref<2x4x16x16xf32, #tpu.memory_space<any>>)
    return
  }
}

</mosaic_0001>

<bundles_post_ra>
// kernel: tpu_custom_call.1
= control target key start
LH: loop header
LB: loop body
LE: loop exit
PB: predicated region body
PF: predicated region fallthrough
CT: control target
= control target key end

     0   :  { %s30_s6 = smov [#allocation2]   ;;  %s31_s7 = smov 131072   ;;  %s49_s0 = inlined_call_operand.hbm [shape: f32[2,4,16,16], index: 0, kind: input, shape index: {}]   ;;  %s50_s1 = inlined_call_operand.hbm [shape: f32[2,4,16,16], index: 1, kind: output, shape index: {}]  }
   0x1   :  { %s32_s8 = smov 0  }
   0x2   :  { %12 = dma.general %s49_s0, 2048, %s50_s1, %s30_s6, %s31_s7, [#allocation4], %s32_s8, 0  }
   0x3   :  { %28 = dma.done.wait [#allocation2], 2048 }
   0x4   :  { %29 = vsyncadd [#allocation2], 4294965248 }
   0x5   :  { %18 = vsyncmov [#allocation2] }
   0x8   :  { %s19_s13 = vpop.sfrf %18 }
   0x9   :  { %p24_p0 = scmp.ne.s32.totalorder %s19_s13, 0 }
   0xb   :  { %23 = shalt.err (%p24_p0)  }

</bundles_post_ra>
